<compile_context>
chip_gen: v5e
topology: v5e:2x2
jax: 0.10.0
libtpu: 0.0.40
codegen_flags: <defaults>
</compile_context>

<pallas_src>
import functools

import jax
import jax.numpy as jnp
from jax.experimental import pallas as pl
from jax.experimental.pallas import tpu as pltpu


def _series_decomp_kernel(x_ref, res_ref, mean_ref, *, kernel_size):
    """Blocks are [TB, C, L]; the time axis L is the 128-wide lane axis."""
    k = kernel_size
    half = (k - 1) // 2
    TB, C, L = x_ref.shape
    inv_k = 1.0 / k

    v_nat = x_ref[...]                        # single load, native dtype
    v = v_nat.astype(jnp.float32)             # f32 accumulate (v5e: no bf16 VALU)

    # Interior window sum: pure circular rolls (XLU slot), no clamps/selects.
    # The wrapped values in the first/last `half` columns are recomputed below,
    # so the roll wrap-around direction does not matter for correctness.
    acc = v
    for s in range(1, half + 1):              # small static trip count
        acc = (acc
               + pltpu.roll(v_nat, shift=s, axis=2).astype(jnp.float32)
               + pltpu.roll(v_nat, shift=L - s, axis=2).astype(jnp.float32))
    # TODO(synk): for very large kernel_size (k >= ~33) switch to a log-step
    # prefix-sum / shifted-difference path instead of the O(k) roll+add chain.

    mean = acc * inv_k
    # NOTE: res = f32(x) - f32(mean) cast once at the end; PyTorch rounds the
    # AvgPool output to the model dtype before subtracting (tiny bf16 mismatch).
    mean_ref[...] = mean.astype(mean_ref.dtype)
    res_ref[...] = (v - mean).astype(res_ref.dtype)

    if half == 0:
        return

    # Replicate-edge fixup: recompute the 2*half boundary columns in closed form
    # (narrow per-column ops only) and overwrite them.
    col0 = v[:, :, 0:1]
    colL = v[:, :, L - 1:L]

    # head_sum(t) = sum_{j=0}^{t+half} v[j] + (half - t) * v[0],   t in [0, half)
    run = col0 * (half + 1.0)
    for j in range(1, half + 1):
        run = run + v[:, :, j:j + 1]
    head_cols = [run]
    for t in range(1, half):
        run = run + v[:, :, t + half:t + half + 1] - col0
        head_cols.append(run)
    head = jnp.concatenate(head_cols, axis=2) if half > 1 else head_cols[0]
    head_mean = head * inv_k
    mean_ref[:, :, 0:half] = head_mean.astype(mean_ref.dtype)
    res_ref[:, :, 0:half] = (v[:, :, 0:half] - head_mean).astype(res_ref.dtype)

    # tail_sum(t) = sum_{j=t-half}^{L-1} v[j] + (t+half-L+1) * v[L-1],  t in [L-half, L)
    run = colL * (half + 1.0)
    for j in range(1, half + 1):
        run = run + v[:, :, L - 1 - j:L - j]
    tail_cols = [run]                                  # t = L-1, then downwards
    for t in range(L - 2, L - 1 - half, -1):
        run = run + v[:, :, t - half:t - half + 1] - colL
        tail_cols.append(run)
    tail_cols.reverse()                                # increasing t order
    tail = jnp.concatenate(tail_cols, axis=2) if half > 1 else tail_cols[0]
    tail_mean = tail * inv_k
    mean_ref[:, :, L - half:L] = tail_mean.astype(mean_ref.dtype)
    res_ref[:, :, L - half:L] = (v[:, :, L - half:L] - tail_mean).astype(res_ref.dtype)


def _round_up(n, m):
    return -(-n // m) * m


def _vmem_capacity_bytes():
    try:
        info = pltpu.get_tpu_info()
        cap = int(getattr(info, "vmem_capacity_bytes", 0) or 0)
        if cap > 0:
            return cap
    except Exception:
        pass
    return 64 << 20   # conservative default: v7x has the smallest per-core VMEM


def _pick_batch_block(B, C, L, dtype):
    """Pick the batch tile TB and vmem_limit_bytes using PHYSICAL (padded) VMEM
    accounting: lanes rounded to 128, sublanes to the dtype tile, 1 input + 2
    output streams double-buffered by the pipeline, plus f32 in-kernel temps."""
    itemsize = jnp.dtype(dtype).itemsize
    sublane = max(8, 32 // itemsize)           # 8 for f32, 16 for bf16, 32 for int8
    c_io = _round_up(C, sublane)
    c_f32 = _round_up(C, 8)
    l_pad = _round_up(L, 128)

    def block_bytes(tb):                       # one padded IO block
        return tb * c_io * l_pad * itemsize

    def footprint(tb):                         # total buffered VMEM per grid step
        streams = 3 * 2 * block_bytes(tb)      # (in + 2 outs) double-buffered
        temps = 4 * tb * c_f32 * l_pad * 4     # v, acc, 2 rolled copies (f32)
        return streams + temps

    cap = _vmem_capacity_bytes()
    budget = min(cap // 2, 24 << 20)

    if footprint(1) > budget:
        if footprint(1) > (cap * 9) // 10:
            # TODO(synk): add an L-tiling grid axis with a (kernel_size-1) halo so
            # a single (1, C, L) row can be split when it exceeds physical VMEM.
            raise ValueError(
                f"series_decomp: one (1, {C}, {L}) row needs ~{footprint(1) >> 20} MiB "
                f"of VMEM, exceeding this TPU's ~{cap >> 20} MiB capacity."
            )
        budget = footprint(1)

    target = 2 << 20                           # ~2 MiB blocks: good DMA granularity
    max_tb = max(1, B // 2)                    # >= 2 grid steps (v7x has 2 TCs)
    tb = 1
    for cand in range(1, max_tb + 1):
        if footprint(cand) > budget:
            break
        tb = cand
        if block_bytes(cand) >= target:
            break

    vmem_limit = int(min(cap, max(footprint(tb) + (8 << 20), 32 << 20)))
    return tb, vmem_limit


def series_decomp(x, kernel_size):
    """res, moving_mean = series_decomp(x);  x: [B, L, C] (PyTorch layout)."""
    if kernel_size % 2 != 1:
        raise ValueError("kernel_size must be odd (PyTorch broadcast semantics)")
    B, L, C = x.shape
    if kernel_size > L:
        raise ValueError("kernel_size must be <= sequence length L")

    # Lane-dense layout: time on the lane axis (C is typically << 128).
    xt = jnp.transpose(x, (0, 2, 1))           # [B, C, L]

    TB, vmem_limit = _pick_batch_block(B, C, L, x.dtype)
    kernel = functools.partial(_series_decomp_kernel, kernel_size=kernel_size)

    res_t, mean_t = pl.pallas_call(
        kernel,
        out_shape=(
            jax.ShapeDtypeStruct((B, C, L), x.dtype),
            jax.ShapeDtypeStruct((B, C, L), x.dtype),
        ),
        grid=(pl.cdiv(B, TB),),
        in_specs=[pl.BlockSpec((TB, C, L), lambda b: (b, 0, 0))],
        out_specs=(
            pl.BlockSpec((TB, C, L), lambda b: (b, 0, 0)),
            pl.BlockSpec((TB, C, L), lambda b: (b, 0, 0)),
        ),
        compiler_params=pltpu.CompilerParams(
            dimension_semantics=("parallel",),
            vmem_limit_bytes=vmem_limit,
        ),
    )(xt)

    res = jnp.transpose(res_t, (0, 2, 1))
    mean = jnp.transpose(mean_t, (0, 2, 1))
    return res, mean


def _series_decomp_ref(x, kernel_size):
    """Pure-JAX reference mirroring the PyTorch module (for validation)."""
    half = (kernel_size - 1) // 2
    front = jnp.repeat(x[:, 0:1, :], half, axis=1)
    end = jnp.repeat(x[:, -1:, :], half, axis=1)
    xpad = jnp.concatenate([front, x, end], axis=1)
    L = x.shape[1]
    windows = jnp.stack([xpad[:, i:i + L, :] for i in range(kernel_size)], axis=0)
    mean = jnp.mean(windows, axis=0)
    return x - mean, mean


if __name__ == "__main__":
    key = jax.random.PRNGKey(0)

    for (B, L, C, k) in [(2, 24, 7, 5), (2, 16, 8, 9)]:
        key, sub = jax.random.split(key)
        x = jax.random.normal(sub, (B, L, C), dtype=jnp.float32)

        res, mean = series_decomp(x, k)
        jax.block_until_ready((res, mean))

        res_ref, mean_ref = _series_decomp_ref(x, k)
        assert res.shape == (B, L, C) and mean.shape == (B, L, C)
        assert jnp.allclose(mean, mean_ref, atol=1e-5, rtol=1e-5)
        assert jnp.allclose(res, res_ref, atol=1e-5, rtol=1e-5)

    print("KERNEL_OK")
</pallas_src>

<mosaic_0001>
module attributes {stable_mosaic.version = 11 : i64} {
  func.func @_series_decomp_kernel(%arg0: i32, %arg1: memref<1x7x24xf32, #tpu.memory_space<vmem>>, %arg2: memref<1x7x24xf32, #tpu.memory_space<vmem>>, %arg3: memref<1x7x24xf32, #tpu.memory_space<vmem>>) attributes {dimension_semantics = [#tpu.dimension_semantics<parallel>], iteration_bounds = array<i64: 2>, scalar_prefetch = 0 : i64, scratch_operands = 0 : i64, tpu.core_type = #tpu.core_type<tc>, window_params = [{transform_indices = @transform_0, window_bounds = array<i64: 1, 7, 24>}, {transform_indices = @transform_1, window_bounds = array<i64: 1, 7, 24>}, {transform_indices = @transform_2, window_bounds = array<i64: 1, 7, 24>}]} {
    %c0 = arith.constant 0 : index
    %c0_0 = arith.constant 0 : index
    %c0_1 = arith.constant 0 : index
    %0 = vector.load %arg1[%c0, %c0_0, %c0_1] : memref<1x7x24xf32, #tpu.memory_space<vmem>>, vector<1x7x24xf32>
    %c1_i32 = arith.constant 1 : i32
    %1 = tpu.dynamic_rotate %0 by %c1_i32 dim 2 : vector<1x7x24xf32>, i32 -> vector<1x7x24xf32>
    %2 = arith.addf %0, %1 : vector<1x7x24xf32>
    %c23_i32 = arith.constant 23 : i32
    %3 = tpu.dynamic_rotate %0 by %c23_i32 dim 2 : vector<1x7x24xf32>, i32 -> vector<1x7x24xf32>
    %4 = arith.addf %2, %3 : vector<1x7x24xf32>
    %c2_i32 = arith.constant 2 : i32
    %5 = tpu.dynamic_rotate %0 by %c2_i32 dim 2 : vector<1x7x24xf32>, i32 -> vector<1x7x24xf32>
    %6 = arith.addf %4, %5 : vector<1x7x24xf32>
    %c22_i32 = arith.constant 22 : i32
    %7 = tpu.dynamic_rotate %0 by %c22_i32 dim 2 : vector<1x7x24xf32>, i32 -> vector<1x7x24xf32>
    %8 = arith.addf %6, %7 : vector<1x7x24xf32>
    %cst = arith.constant 2.000000e-01 : f32
    %9 = vector.broadcast %cst : f32 to vector<1x7x24xf32>
    %10 = arith.mulf %8, %9 : vector<1x7x24xf32>
    %c0_2 = arith.constant 0 : index
    %c0_3 = arith.constant 0 : index
    %c0_4 = arith.constant 0 : index
    %11 = vector.load %arg3[%c0_2, %c0_3, %c0_4] : memref<1x7x24xf32, #tpu.memory_space<vmem>>, vector<1x7x24xf32>
    tpu.vector_store %arg3[%c0_2, %c0_3, %c0_4], %10 {strides = array<i32>} : memref<1x7x24xf32, #tpu.memory_space<vmem>>, vector<1x7x24xf32>,
    %12 = arith.subf %0, %10 : vector<1x7x24xf32>
    %c0_5 = arith.constant 0 : index
    %c0_6 = arith.constant 0 : index
    %c0_7 = arith.constant 0 : index
    %13 = vector.load %arg2[%c0_5, %c0_6, %c0_7] : memref<1x7x24xf32, #tpu.memory_space<vmem>>, vector<1x7x24xf32>
    tpu.vector_store %arg2[%c0_5, %c0_6, %c0_7], %12 {strides = array<i32>} : memref<1x7x24xf32, #tpu.memory_space<vmem>>, vector<1x7x24xf32>,
    %14 = vector.extract_strided_slice %0 {offsets = [0, 0, 0], sizes = [1, 7, 1], strides = [1, 1, 1]} : vector<1x7x24xf32> to vector<1x7x1xf32>
    %15 = vector.extract_strided_slice %0 {offsets = [0, 0, 23], sizes = [1, 7, 1], strides = [1, 1, 1]} : vector<1x7x24xf32> to vector<1x7x1xf32>
    %cst_8 = arith.constant 3.000000e+00 : f32
    %16 = vector.broadcast %cst_8 : f32 to vector<1x7x1xf32>
    %17 = arith.mulf %14, %16 : vector<1x7x1xf32>
    %18 = vector.extract_strided_slice %0 {offsets = [0, 0, 1], sizes = [1, 7, 1], strides = [1, 1, 1]} : vector<1x7x24xf32> to vector<1x7x1xf32>
    %19 = arith.addf %17, %18 : vector<1x7x1xf32>
    %20 = vector.extract_strided_slice %0 {offsets = [0, 0, 2], sizes = [1, 7, 1], strides = [1, 1, 1]} : vector<1x7x24xf32> to vector<1x7x1xf32>
    %21 = arith.addf %19, %20 : vector<1x7x1xf32>
    %22 = vector.extract_strided_slice %0 {offsets = [0, 0, 3], sizes = [1, 7, 1], strides = [1, 1, 1]} : vector<1x7x24xf32> to vector<1x7x1xf32>
    %23 = arith.addf %21, %22 : vector<1x7x1xf32>
    %24 = arith.subf %23, %14 : vector<1x7x1xf32>
    %25 = tpu.concatenate %21, %24 in 2 : vector<1x7x1xf32>, vector<1x7x1xf32> -> vector<1x7x2xf32>
    %cst_9 = arith.constant 2.000000e-01 : f32
    %26 = vector.broadcast %cst_9 : f32 to vector<1x7x2xf32>
    %27 = arith.mulf %25, %26 : vector<1x7x2xf32>
    %c0_10 = arith.constant 0 : index
    %c0_11 = arith.constant 0 : index
    %c0_12 = arith.constant 0 : index
    %28 = vector.load %arg3[%c0_10, %c0_11, %c0_12] : memref<1x7x24xf32, #tpu.memory_space<vmem>>, vector<1x7x2xf32>
    tpu.vector_store %arg3[%c0_10, %c0_11, %c0_12], %27 {strides = array<i32>} : memref<1x7x24xf32, #tpu.memory_space<vmem>>, vector<1x7x2xf32>,
    %29 = vector.extract_strided_slice %0 {offsets = [0, 0, 0], sizes = [1, 7, 2], strides = [1, 1, 1]} : vector<1x7x24xf32> to vector<1x7x2xf32>
    %30 = arith.subf %29, %27 : vector<1x7x2xf32>
    %c0_13 = arith.constant 0 : index
    %c0_14 = arith.constant 0 : index
    %c0_15 = arith.constant 0 : index
    %31 = vector.load %arg2[%c0_13, %c0_14, %c0_15] : memref<1x7x24xf32, #tpu.memory_space<vmem>>, vector<1x7x2xf32>
    tpu.vector_store %arg2[%c0_13, %c0_14, %c0_15], %30 {strides = array<i32>} : memref<1x7x24xf32, #tpu.memory_space<vmem>>, vector<1x7x2xf32>,
    %cst_16 = arith.constant 3.000000e+00 : f32
    %32 = vector.broadcast %cst_16 : f32 to vector<1x7x1xf32>
    %33 = arith.mulf %15, %32 : vector<1x7x1xf32>
    %34 = vector.extract_strided_slice %0 {offsets = [0, 0, 22], sizes = [1, 7, 1], strides = [1, 1, 1]} : vector<1x7x24xf32> to vector<1x7x1xf32>
    %35 = arith.addf %33, %34 : vector<1x7x1xf32>
    %36 = vector.extract_strided_slice %0 {offsets = [0, 0, 21], sizes = [1, 7, 1], strides = [1, 1, 1]} : vector<1x7x24xf32> to vector<1x7x1xf32>
    %37 = arith.addf %35, %36 : vector<1x7x1xf32>
    %38 = vector.extract_strided_slice %0 {offsets = [0, 0, 20], sizes = [1, 7, 1], strides = [1, 1, 1]} : vector<1x7x24xf32> to vector<1x7x1xf32>
    %39 = arith.addf %37, %38 : vector<1x7x1xf32>
    %40 = arith.subf %39, %15 : vector<1x7x1xf32>
    %41 = tpu.concatenate %40, %37 in 2 : vector<1x7x1xf32>, vector<1x7x1xf32> -> vector<1x7x2xf32>
    %cst_17 = arith.constant 2.000000e-01 : f32
    %42 = vector.broadcast %cst_17 : f32 to vector<1x7x2xf32>
    %43 = arith.mulf %41, %42 : vector<1x7x2xf32>
    %c0_18 = arith.constant 0 : index
    %c0_19 = arith.constant 0 : index
    %c22 = arith.constant 22 : index
    %44 = vector.load %arg3[%c0_18, %c0_19, %c22] : memref<1x7x24xf32, #tpu.memory_space<vmem>>, vector<1x7x2xf32>
    tpu.vector_store %arg3[%c0_18, %c0_19, %c22], %43 {strides = array<i32>} : memref<1x7x24xf32, #tpu.memory_space<vmem>>, vector<1x7x2xf32>,
    %45 = vector.extract_strided_slice %0 {offsets = [0, 0, 22], sizes = [1, 7, 2], strides = [1, 1, 1]} : vector<1x7x24xf32> to vector<1x7x2xf32>
    %46 = arith.subf %45, %43 : vector<1x7x2xf32>
    %c0_20 = arith.constant 0 : index
    %c0_21 = arith.constant 0 : index
    %c22_22 = arith.constant 22 : index
    %47 = vector.load %arg2[%c0_20, %c0_21, %c22_22] : memref<1x7x24xf32, #tpu.memory_space<vmem>>, vector<1x7x2xf32>
    tpu.vector_store %arg2[%c0_20, %c0_21, %c22_22], %46 {strides = array<i32>} : memref<1x7x24xf32, #tpu.memory_space<vmem>>, vector<1x7x2xf32>,
    return
  }
  func.func @transform_0(%arg0: i32) -> (i32, i32, i32) {
    %c0_i32 = arith.constant 0 : i32
    %c0_i32_0 = arith.constant 0 : i32
    %c0_i32_1 = arith.constant 0 : i32
    return %arg0, %c0_i32, %c0_i32_0 : i32, i32, i32
  }
  func.func @transform_1(%arg0: i32) -> (i32, i32, i32) {
    %c0_i32 = arith.constant 0 : i32
    %c0_i32_0 = arith.constant 0 : i32
    %c0_i32_1 = arith.constant 0 : i32
    return %arg0, %c0_i32, %c0_i32_0 : i32, i32, i32
  }
  func.func @transform_2(%arg0: i32) -> (i32, i32, i32) {
    %c0_i32 = arith.constant 0 : i32
    %c0_i32_0 = arith.constant 0 : i32
    %c0_i32_1 = arith.constant 0 : i32
    return %arg0, %c0_i32, %c0_i32_0 : i32, i32, i32
  }
}

</mosaic_0001>

<bundles_post_ra>
// kernel: tpu_custom_call.1
= control target key start
LH: loop header
LB: loop body
LE: loop exit
PB: predicated region body
PF: predicated region fallthrough
CT: control target
= control target key end

     0   :  { %s382_s9 = smov 0   ;;  %s429_s0 = inlined_call_operand.vmem [shape: f32[2,7,24], index: 0, kind: input, shape index: {}]   ;;  %s430_s1 = inlined_call_operand.vmem [shape: f32[2,7,24], index: 1, kind: output, shape index: {0}]   ;;  %s431_s2 = inlined_call_operand.vmem [shape: f32[2,7,24], index: 2, kind: output, shape index: {1}]  }
   0x1 LB: > { %s321_s10 = sadd.s32 4294967295, %s355_s9   ;;  %p325_p0 = scmp.ge.s32.totalorder %s355_s9, 1  ;;  %s355_s9 = sphi %s382_s9, %s13_s9  }
   0x2   : > { %p114_p1 = scmp.lt.s32.totalorder %s355_s9, 3 }
   0x4   : > { %p115_p2 = pnand %p325_p0, %p114_p1 }
   0x5   : > { %p138_p3 = scmp.lt.s32.totalorder (!%p115_p2), %s321_s10, 1  ;;  %s357_s15 = smov (!%p115_p2), 24  }
   0x6   : > { %118 = sbr.rel (%p115_p2) target bundleno = 378 (0x17a), region = 24  ;;  %s358_s16 = smov (!%p115_p2), 2  }
   0x7   : > { %s359_s17 = smov (!%p115_p2), 1   ;;  %s360_s18 = smov (!%p115_p2), 3  }
   0x8   : > { %s361_s19 = smov (!%p115_p2), 126   ;;  %s362_s20 = smov (!%p115_p2), 125  }
   0x9   : > { %s363_s21 = smov (!%p115_p2), 127   ;;  %s364_s22 = smov (!%p115_p2), 106  }
   0xa   : > { %s365_s23 = smov (!%p115_p2), 105   ;;  %s366_s24 = smov (!%p115_p2), 22  }
   0xb   : > { %s433_s10 = smov (!%p138_p3, %s321_s10), 1  ;;  %vm151_vm0 = vcmask 1047744   ;;  %vm199_vm1 = vcmask 7168   ;;  %vm176_vm2 = vcmask 194560   ;;  %vm202_vm3 = vcmask 14336  }
   0xc   : > { %s390_s11 = sshll.u32 %s433_s10, 3  ;;  %vm233_vm4 = vcmask 194736  }
   0xd   : > { %s141_s14 = scalar_lea.vmem %s429_s0, %s390_s11  ;;  %s149_s27 = scalar_lea.vmem %s431_s2, %s390_s11 }
   0xe   : > { %v396_v0 = vld [vmem:[%s141_s14] sm:$0x7f]  ;;  %s145_s30 = scalar_lea.vmem %s430_s1, %s390_s11 }
   0xf   : > { %152 = vrot.lane.b32.xlu0 %v396_v0, %s357_s15  ;;  %210 = vrot.lane.b32.xlu1 %v396_v0, %s358_s16  ;;  %v180_v4 = vmul.f32 3.0, %v396_v0 }
  0x17   : > { %206 = vrot.lane.b32.xlu0 %v396_v0, %s359_s17  ;;  %214 = vrot.lane.b32.xlu1 %v396_v0, %s360_s18 }
  0x1f   : > { %186 = vrot.lane.b32.xlu0 %v396_v0, %s361_s19  ;;  %190 = vrot.lane.b32.xlu1 %v396_v0, %s362_s20 }
  0x81   : > { %v153_v1 = vpop.permute.xlu0 %152  ;;  %v211_v2 = vpop.permute.xlu1 %210 }
  0x82   : > { %v154_v3 = vsel %vm151_vm0, %v153_v1, %v396_v0 }
  0x83   : > { %155 = vrot.lane.b32.xlu2 %v154_v3, %s357_s15 }
  0x89   : > { %v207_v5 = vpop.permute.xlu0 %206  ;;  %v215_v7 = vpop.permute.xlu1 %214 }
  0x8a   : > { %v209_v6 = vadd.f32 %v207_v5, %v180_v4 }
  0x8b   : > { %182 = vrot.lane.b32.xlu2 %v396_v0, %s363_s21 }
  0x8c   : > { %v213_v8 = vadd.f32 %v211_v2, %v209_v6 }
  0x8e   : > { %v217_v9 = vadd.f32 %v215_v7, %v213_v8  ;;  %224 = vrot.lane.b32.xlu0 %v213_v8, %s364_s22 }
  0x90   : > { %v218_v10 = vsub.f32 %v217_v9, %v396_v0 }
  0x91   : > { %v187_v14 = vpop.permute.xlu0 %186  ;;  %v191_v16 = vpop.permute.xlu1 %190 }
  0x93   : > { %220 = vrot.lane.b32.xlu2 %v218_v10, %s365_s23 }
  0xdd   : > { %v156_v11 = vpop.permute.xlu2 %155 }
  0xde   : > { %v157_v12 = vsel %vm151_vm0, %v156_v11, %v396_v0 }
  0xdf   : > { %159 = vrot.lane.b32.xlu1 %v157_v12, %s365_s23  ;;  %167 = vrot.lane.b32.xlu0 %v157_v12, %s364_s22 }
  0xe0   : > { %163 = vrot.lane.b32.xlu2 %v157_v12, %s363_s21 }
  0xe5   : > { %v183_v13 = vpop.permute.xlu2 %182 }
  0xe6   : > { %v185_v15 = vadd.f32 %v183_v13, %v180_v4 }
  0xe7   : > { %171 = vrot.lane.b32.xlu1 %v157_v12, %s361_s19 }
  0xe8   : > { %v189_v17 = vadd.f32 %v187_v14, %v185_v15 }
  0xea   : > { %v193_v18 = vadd.f32 %v191_v16, %v189_v17 }
  0xec   : > { %v194_v19 = vsub.f32 %v193_v18, %v396_v0 }
  0xed   : > { %v221_v20 = vpop.permute.xlu2 %220 }
  0xee   : > { %196 = vrot.lane.b32.xlu2 %v194_v19, %s359_s17 }
 0x100   : > { %v225_v21 = vpop.permute.xlu0 %224 }
 0x101   : > { %v227_v22 = vsel %vm199_vm1, %v221_v20, %v225_v21 }
 0x102   : > { %v228_v23 = vmul.f32 0.2, %v227_v22 }
 0x104   : > { %230 = vrot.lane.b32.xlu0 %v228_v23, %s366_s24 }
 0x13a   : > { %v164_v24 = vpop.permute.xlu2 %163 }
 0x148   : > { %v197_v28 = vpop.permute.xlu2 %196 }
 0x149   : > { %v200_v30 = vsel %vm199_vm1, %v189_v17, %v197_v28 }
 0x14a   : > { %v201_v34 = vmul.f32 0.2, %v200_v30 }
 0x14c   : > { %v204_v37 = vsub.f32 %v396_v0, %v201_v34 }
 0x151   : > { %v160_v25 = vpop.permute.xlu1 %159  ;;  %v168_v29 = vpop.permute.xlu0 %167 }
 0x152   : > { %v162_v26 = vadd.f32 %v160_v25, %v396_v0 }
 0x154   : > { %v166_v27 = vadd.f32 %v164_v24, %v162_v26 }
 0x156   : > { %v170_v31 = vadd.f32 %v168_v29, %v166_v27 }
 0x159   : > { %v172_v32 = vpop.permute.xlu1 %171 }
 0x15a   : > { %v174_v33 = vadd.f32 %v172_v32, %v170_v31 }
 0x15c   : > { %v175_v35 = vmul.f32 0.2, %v174_v33 }
 0x15e   : > { %177 = vst.msk [vmem:[%s149_s27] sm:$0x7f] %vm176_vm2, %v175_v35  ;;  %v178_v36 = vsub.f32 %v396_v0, %v175_v35 }
 0x15f   : > { %203 = vst.msk [vmem:[%s149_s27] sm:$0x7f] %vm202_vm3, %v201_v34 }
 0x160   : > { %179 = vst.msk [vmem:[%s145_s30] sm:$0x7f] %vm176_vm2, %v178_v36 }
 0x161   : > { %205 = vst.msk [vmem:[%s145_s30] sm:$0x7f] %vm202_vm3, %v204_v37 }
 0x176   : > { %v231_v38 = vpop.permute.xlu0 %230 }
 0x177   : > { %234 = vst.msk [vmem:[%s149_s27] sm:$0x7f] %vm233_vm4, %v231_v38  ;;  %v235_v39 = vsub.f32 %v396_v0, %v231_v38 }
 0x179   : > { %236 = vst.msk [vmem:[%s145_s30] sm:$0x7f] %vm233_vm4, %v235_v39 }
 0x17a PF: > { %s13_s9 = sadd.s32 1, %s355_s9  }
 0x17b   : > { %p10_p4 = scmp.ge.s32.totalorder %s13_s9, 4  }
 0x17d   :  { %12 = sbr.rel (!%p10_p4) target bundleno = 1 (0x1), region = 66 }

</bundles_post_ra>
